<compile_context>
chip_gen: v5e
topology: v5e:2x2
jax: 0.10.0
libtpu: 0.0.40
codegen_flags: <defaults>
</compile_context>

<pallas_src>
import jax
import jax.numpy as jnp
from jax.experimental import pallas as pl
from jax.experimental.pallas import tpu as pltpu

VOCAB_SIZE = 50
EMB_DIM = 64
HIDDEN = 32
OUT_DIM = 1
SEQ = 8
BATCH = 2

BATCH_PAD = 8                       # pad batch to native 8-sublane granularity
VOCAB_PAD = 64                      # pad vocab so the one-hot gather matmul is aligned
LANE = 128                          # lane-dense output width (unmasked stores)
SB = SEQ * BATCH_PAD                # rows of the "all timesteps" input slab


def lstm_kernel(tok_ref, emb_ref, wih_ref, whh_ref, b_ref, wlin_ref, blin_ref,
                out_ref):
    """Embedding + full LSTM recurrence + final Linear in one invocation.

    tok_ref  : (SEQ*BATCH_PAD, 1) int32  token ids, row index = t*BATCH_PAD + b
    emb_ref  : (VOCAB_PAD, EMB)   f32    zero-padded embedding table
    wih_ref  : (EMB, 4H)          f32    W_ih^T
    whh_ref  : (H, 4H)            f32    W_hh^T
    b_ref    : (1, 4H)            f32    b_ih + b_hh
    wlin_ref : (H, 128)           f32    linear weight, zero-padded past OUT_DIM
    blin_ref : (1, 128)           f32    linear bias, zero-padded past OUT_DIM
    out_ref  : (BATCH_PAD, 128)   f32    logits in columns [:OUT_DIM]
    """
    H = HIDDEN

    # --- fused embedding lookup: exact one-hot gather via a single MXU call.
    tok = tok_ref[...]                                                # (SB, 1) int32
    vocab_iota = jax.lax.broadcasted_iota(jnp.int32, (SB, VOCAB_PAD), 1)
    onehot = (tok == vocab_iota).astype(jnp.float32)                  # (SB, VOCAB_PAD)
    x_all = jnp.dot(onehot, emb_ref[...],
                    preferred_element_type=jnp.float32)               # (SB, EMB)

    # --- hoisted input projection for ALL timesteps at once (+ combined bias).
    gates_x = jnp.dot(x_all, wih_ref[...],
                      preferred_element_type=jnp.float32) + b_ref[...]  # (SB, 4H)

    whh = whh_ref[...]                                                # (H, 4H)

    # PyTorch gate order (i, f, g, o): "g" lanes use tanh, the rest sigmoid.
    # sigmoid(x) = 0.5*tanh(0.5*x) + 0.5, so a single tanh EUP push covers all
    # four gates; pre/post scale-offset vectors are hoisted out of the loop.
    lane = jax.lax.broadcasted_iota(jnp.int32, (BATCH_PAD, 4 * H), 1)
    g_mask = (lane >= 2 * H) & (lane < 3 * H)
    pre_scale = jnp.where(g_mask, 1.0, 0.5)                           # (8, 4H)
    post_mul = jnp.where(g_mask, 1.0, 0.5)
    post_add = jnp.where(g_mask, 0.0, 0.5)

    h = jnp.zeros((BATCH_PAD, H), jnp.float32)
    c = jnp.zeros((BATCH_PAD, H), jnp.float32)

    # Fully unrolled recurrence: only the small recurrent matmul + one tanh
    # push (+ a narrow tanh for c) are serial; everything stays in vregs.
    for t in range(SEQ):
        gates = gates_x[t * BATCH_PAD:(t + 1) * BATCH_PAD, :] + jnp.dot(
            h, whh, preferred_element_type=jnp.float32)               # (8, 4H)
        act = jnp.tanh(gates * pre_scale) * post_mul + post_add       # one EUP push
        i_g = act[:, 0 * H:1 * H]
        f_g = act[:, 1 * H:2 * H]
        g_g = act[:, 2 * H:3 * H]
        o_g = act[:, 3 * H:4 * H]
        c = f_g * c + i_g * g_g
        h = o_g * jnp.tanh(c)

    # --- fused final Linear into a lane-dense 128-wide slab (unmasked store).
    out_ref[...] = jnp.dot(h, wlin_ref[...],
                           preferred_element_type=jnp.float32) + blin_ref[...]


def prepare_inference_params(params):
    """One-time padding of constant parameters (outside the per-call hot path)."""
    emb_pad = jnp.zeros((VOCAB_PAD, EMB_DIM), jnp.float32).at[:VOCAB_SIZE].set(
        params["embedding"])
    w_lin_pad = jnp.zeros((HIDDEN, LANE), jnp.float32).at[:, :OUT_DIM].set(
        params["w_lin_t"])
    b_lin_pad = jnp.zeros((1, LANE), jnp.float32).at[:, :OUT_DIM].set(
        params["b_lin"])
    return {
        "emb_pad": emb_pad,
        "w_ih_t": params["w_ih_t"],
        "w_hh_t": params["w_hh_t"],
        "b": params["b"],
        "w_lin_pad": w_lin_pad,
        "b_lin_pad": b_lin_pad,
    }


def model_forward(token_ids, iparams):
    """Full eval-mode forward: embedding + (identity) dropout + LSTM + linear."""
    # Dropout(p=0.58) is identity in eval mode.
    # TODO(synk): training-mode dropout not implemented.
    seq, batch = token_ids.shape

    # pad batch to 8 sublanes (pad rows use token 0; discarded below)
    tok_pad = jnp.zeros((seq, BATCH_PAD), jnp.int32).at[:, :batch].set(
        token_ids.astype(jnp.int32))
    tok_flat = tok_pad.reshape(seq * BATCH_PAD, 1)   # row = t*BATCH_PAD + b

    # Single invocation, no grid. If batch ever scales up, add a leading batch
    # grid axis marked "parallel" so v7x's two TensorCores each take a shard.
    out_pad = pl.pallas_call(
        lstm_kernel,
        out_shape=jax.ShapeDtypeStruct((BATCH_PAD, LANE), jnp.float32),
        in_specs=[pl.BlockSpec(memory_space=pltpu.MemorySpace.VMEM)] * 7,
        out_specs=pl.BlockSpec(memory_space=pltpu.MemorySpace.VMEM),
    )(tok_flat, iparams["emb_pad"], iparams["w_ih_t"], iparams["w_hh_t"],
      iparams["b"], iparams["w_lin_pad"], iparams["b_lin_pad"])

    return out_pad[:batch, :OUT_DIM]                                  # (batch, 1)


def reference_forward(token_ids, params):
    x_emb = jnp.take(params["embedding"], token_ids, axis=0)          # (seq, batch, emb)
    H = HIDDEN

    def step(carry, x_t):
        h, c = carry
        gates = x_t @ params["w_ih_t"] + h @ params["w_hh_t"] + params["b"]
        i_g = jax.nn.sigmoid(gates[:, 0 * H:1 * H])
        f_g = jax.nn.sigmoid(gates[:, 1 * H:2 * H])
        g_g = jnp.tanh(gates[:, 2 * H:3 * H])
        o_g = jax.nn.sigmoid(gates[:, 3 * H:4 * H])
        c = f_g * c + i_g * g_g
        h = o_g * jnp.tanh(c)
        return (h, c), None

    h0 = jnp.zeros((BATCH, H), jnp.float32)
    c0 = jnp.zeros((BATCH, H), jnp.float32)
    (h, _), _ = jax.lax.scan(step, (h0, c0), x_emb)
    return h @ params["w_lin_t"] + params["b_lin"]


def init_params(key):
    ks = jax.random.split(key, 6)
    scale = 1.0 / jnp.sqrt(HIDDEN)
    return {
        "embedding": jax.random.normal(ks[0], (VOCAB_SIZE, EMB_DIM), jnp.float32),
        # pre-transposed: (emb, 4H) and (H, 4H); combined bias b_ih + b_hh
        "w_ih_t": jax.random.uniform(ks[1], (EMB_DIM, 4 * HIDDEN), jnp.float32,
                                     -scale, scale),
        "w_hh_t": jax.random.uniform(ks[2], (HIDDEN, 4 * HIDDEN), jnp.float32,
                                     -scale, scale),
        "b": jax.random.uniform(ks[3], (1, 4 * HIDDEN), jnp.float32,
                                -scale, scale),
        "w_lin_t": jax.random.uniform(ks[4], (HIDDEN, OUT_DIM), jnp.float32,
                                      -scale, scale),
        "b_lin": jax.random.uniform(ks[5], (1, OUT_DIM), jnp.float32,
                                    -scale, scale),
    }


if __name__ == "__main__":
    key = jax.random.PRNGKey(0)
    pkey, dkey = jax.random.split(key)
    params = init_params(pkey)
    iparams = prepare_inference_params(params)

    # token ids: (seq, batch) — nn.LSTM default is seq-first
    token_ids = jax.random.randint(dkey, (SEQ, BATCH), 0, VOCAB_SIZE, jnp.int32)

    fwd = jax.jit(model_forward)
    out = jax.block_until_ready(fwd(token_ids, iparams))

    ref = reference_forward(token_ids, params)
    assert out.shape == (BATCH, OUT_DIM)
    assert jnp.allclose(out, ref, atol=1e-5, rtol=1e-5), float(jnp.max(jnp.abs(out - ref)))

    print("KERNEL_OK")
</pallas_src>

<mosaic_0001>
module attributes {stable_mosaic.version = 11 : i64} {
  func.func @lstm_kernel(%arg0: memref<64x1xi32, #tpu.memory_space<vmem>>, %arg1: memref<64x64xf32, #tpu.memory_space<vmem>>, %arg2: memref<64x128xf32, #tpu.memory_space<vmem>>, %arg3: memref<32x128xf32, #tpu.memory_space<vmem>>, %arg4: memref<1x128xf32, #tpu.memory_space<vmem>>, %arg5: memref<32x128xf32, #tpu.memory_space<vmem>>, %arg6: memref<1x128xf32, #tpu.memory_space<vmem>>, %arg7: memref<8x128xf32, #tpu.memory_space<vmem>>) attributes {dimension_semantics = [], scalar_prefetch = 0 : i64, scratch_operands = 0 : i64, tpu.core_type = #tpu.core_type<tc>} {
    %c0 = arith.constant 0 : index
    %c0_0 = arith.constant 0 : index
    %0 = vector.load %arg0[%c0, %c0_0] : memref<64x1xi32, #tpu.memory_space<vmem>>, vector<64x1xi32>
    %1 = tpu.iota {dimensions = array<i32: 1>} : vector<64x64xi32>
    %2 = vector.broadcast %0 : vector<64x1xi32> to vector<64x64xi32>
    %3 = arith.cmpi eq, %2, %1 : vector<64x64xi32>
    %4 = arith.extui %3 : vector<64x64xi1> to vector<64x64xi32>
    %5 = arith.sitofp %4 : vector<64x64xi32> to vector<64x64xf32>
    %c0_1 = arith.constant 0 : index
    %c0_2 = arith.constant 0 : index
    %6 = vector.load %arg1[%c0_1, %c0_2] : memref<64x64xf32, #tpu.memory_space<vmem>>, vector<64x64xf32>
    %cst = arith.constant dense<0.000000e+00> : vector<64x64xf32>
    %7 = tpu.matmul %5, %6, %cst {dimension_numbers = #tpu.dot_dimension_numbers<[1], [0], [0], [1], [0, 0, 1, 1], [], []>} : vector<64x64xf32>, vector<64x64xf32>, vector<64x64xf32> -> vector<64x64xf32>
    %c0_3 = arith.constant 0 : index
    %c0_4 = arith.constant 0 : index
    %8 = vector.load %arg2[%c0_3, %c0_4] : memref<64x128xf32, #tpu.memory_space<vmem>>, vector<64x128xf32>
    %cst_5 = arith.constant dense<0.000000e+00> : vector<64x128xf32>
    %9 = tpu.matmul %7, %8, %cst_5 {dimension_numbers = #tpu.dot_dimension_numbers<[1], [0], [0], [1], [0, 0, 1, 1], [], []>} : vector<64x64xf32>, vector<64x128xf32>, vector<64x128xf32> -> vector<64x128xf32>
    %c0_6 = arith.constant 0 : index
    %c0_7 = arith.constant 0 : index
    %10 = vector.load %arg4[%c0_6, %c0_7] : memref<1x128xf32, #tpu.memory_space<vmem>>, vector<1x128xf32>
    %11 = vector.broadcast %10 : vector<1x128xf32> to vector<64x128xf32>
    %12 = arith.addf %9, %11 : vector<64x128xf32>
    %c0_8 = arith.constant 0 : index
    %c0_9 = arith.constant 0 : index
    %13 = vector.load %arg3[%c0_8, %c0_9] : memref<32x128xf32, #tpu.memory_space<vmem>>, vector<32x128xf32>
    %14 = tpu.iota {dimensions = array<i32: 1>} : vector<8x128xi32>
    %c64_i32 = arith.constant 64 : i32
    %15 = vector.broadcast %c64_i32 : i32 to vector<8x128xi32>
    %16 = arith.cmpi sge, %14, %15 : vector<8x128xi32>
    %c96_i32 = arith.constant 96 : i32
    %17 = vector.broadcast %c96_i32 : i32 to vector<8x128xi32>
    %18 = arith.cmpi slt, %14, %17 : vector<8x128xi32>
    %19 = arith.andi %16, %18 : vector<8x128xi1>
    %cst_10 = arith.constant 1.000000e+00 : f32
    %cst_11 = arith.constant 5.000000e-01 : f32
    %20 = vector.broadcast %cst_10 : f32 to vector<8x128xf32>
    %21 = vector.broadcast %cst_11 : f32 to vector<8x128xf32>
    %22 = arith.select %19, %20, %21 : vector<8x128xi1>, vector<8x128xf32>
    %cst_12 = arith.constant 1.000000e+00 : f32
    %cst_13 = arith.constant 5.000000e-01 : f32
    %23 = vector.broadcast %cst_12 : f32 to vector<8x128xf32>
    %24 = vector.broadcast %cst_13 : f32 to vector<8x128xf32>
    %25 = arith.select %19, %23, %24 : vector<8x128xi1>, vector<8x128xf32>
    %cst_14 = arith.constant 0.000000e+00 : f32
    %cst_15 = arith.constant 5.000000e-01 : f32
    %26 = vector.broadcast %cst_14 : f32 to vector<8x128xf32>
    %27 = vector.broadcast %cst_15 : f32 to vector<8x128xf32>
    %28 = arith.select %19, %26, %27 : vector<8x128xi1>, vector<8x128xf32>
    %cst_16 = arith.constant 0.000000e+00 : f32
    %29 = vector.broadcast %cst_16 : f32 to vector<8x32xf32>
    %cst_17 = arith.constant 0.000000e+00 : f32
    %30 = vector.broadcast %cst_17 : f32 to vector<8x32xf32>
    %31 = vector.extract_strided_slice %12 {offsets = [0, 0], sizes = [8, 128], strides = [1, 1]} : vector<64x128xf32> to vector<8x128xf32>
    %cst_18 = arith.constant dense<0.000000e+00> : vector<8x128xf32>
    %32 = tpu.matmul %29, %13, %cst_18 {dimension_numbers = #tpu.dot_dimension_numbers<[1], [0], [0], [1], [0, 0, 1, 1], [], []>} : vector<8x32xf32>, vector<32x128xf32>, vector<8x128xf32> -> vector<8x128xf32>
    %33 = arith.addf %31, %32 : vector<8x128xf32>
    %34 = arith.mulf %33, %22 : vector<8x128xf32>
    %35 = math.tanh %34 : vector<8x128xf32>
    %36 = arith.mulf %35, %25 : vector<8x128xf32>
    %37 = arith.addf %36, %28 : vector<8x128xf32>
    %38 = vector.extract_strided_slice %37 {offsets = [0, 0], sizes = [8, 32], strides = [1, 1]} : vector<8x128xf32> to vector<8x32xf32>
    %39 = vector.extract_strided_slice %37 {offsets = [0, 32], sizes = [8, 32], strides = [1, 1]} : vector<8x128xf32> to vector<8x32xf32>
    %40 = vector.extract_strided_slice %37 {offsets = [0, 64], sizes = [8, 32], strides = [1, 1]} : vector<8x128xf32> to vector<8x32xf32>
    %41 = vector.extract_strided_slice %37 {offsets = [0, 96], sizes = [8, 32], strides = [1, 1]} : vector<8x128xf32> to vector<8x32xf32>
    %42 = arith.mulf %39, %30 : vector<8x32xf32>
    %43 = arith.mulf %38, %40 : vector<8x32xf32>
    %44 = arith.addf %42, %43 : vector<8x32xf32>
    %45 = math.tanh %44 : vector<8x32xf32>
    %46 = arith.mulf %41, %45 : vector<8x32xf32>
    %47 = vector.extract_strided_slice %12 {offsets = [8, 0], sizes = [8, 128], strides = [1, 1]} : vector<64x128xf32> to vector<8x128xf32>
    %cst_19 = arith.constant dense<0.000000e+00> : vector<8x128xf32>
    %48 = tpu.matmul %46, %13, %cst_19 {dimension_numbers = #tpu.dot_dimension_numbers<[1], [0], [0], [1], [0, 0, 1, 1], [], []>} : vector<8x32xf32>, vector<32x128xf32>, vector<8x128xf32> -> vector<8x128xf32>
    %49 = arith.addf %47, %48 : vector<8x128xf32>
    %50 = arith.mulf %49, %22 : vector<8x128xf32>
    %51 = math.tanh %50 : vector<8x128xf32>
    %52 = arith.mulf %51, %25 : vector<8x128xf32>
    %53 = arith.addf %52, %28 : vector<8x128xf32>
    %54 = vector.extract_strided_slice %53 {offsets = [0, 0], sizes = [8, 32], strides = [1, 1]} : vector<8x128xf32> to vector<8x32xf32>
    %55 = vector.extract_strided_slice %53 {offsets = [0, 32], sizes = [8, 32], strides = [1, 1]} : vector<8x128xf32> to vector<8x32xf32>
    %56 = vector.extract_strided_slice %53 {offsets = [0, 64], sizes = [8, 32], strides = [1, 1]} : vector<8x128xf32> to vector<8x32xf32>
    %57 = vector.extract_strided_slice %53 {offsets = [0, 96], sizes = [8, 32], strides = [1, 1]} : vector<8x128xf32> to vector<8x32xf32>
    %58 = arith.mulf %55, %44 : vector<8x32xf32>
    %59 = arith.mulf %54, %56 : vector<8x32xf32>
    %60 = arith.addf %58, %59 : vector<8x32xf32>
    %61 = math.tanh %60 : vector<8x32xf32>
    %62 = arith.mulf %57, %61 : vector<8x32xf32>
    %63 = vector.extract_strided_slice %12 {offsets = [16, 0], sizes = [8, 128], strides = [1, 1]} : vector<64x128xf32> to vector<8x128xf32>
    %cst_20 = arith.constant dense<0.000000e+00> : vector<8x128xf32>
    %64 = tpu.matmul %62, %13, %cst_20 {dimension_numbers = #tpu.dot_dimension_numbers<[1], [0], [0], [1], [0, 0, 1, 1], [], []>} : vector<8x32xf32>, vector<32x128xf32>, vector<8x128xf32> -> vector<8x128xf32>
    %65 = arith.addf %63, %64 : vector<8x128xf32>
    %66 = arith.mulf %65, %22 : vector<8x128xf32>
    %67 = math.tanh %66 : vector<8x128xf32>
    %68 = arith.mulf %67, %25 : vector<8x128xf32>
    %69 = arith.addf %68, %28 : vector<8x128xf32>
    %70 = vector.extract_strided_slice %69 {offsets = [0, 0], sizes = [8, 32], strides = [1, 1]} : vector<8x128xf32> to vector<8x32xf32>
    %71 = vector.extract_strided_slice %69 {offsets = [0, 32], sizes = [8, 32], strides = [1, 1]} : vector<8x128xf32> to vector<8x32xf32>
    %72 = vector.extract_strided_slice %69 {offsets = [0, 64], sizes = [8, 32], strides = [1, 1]} : vector<8x128xf32> to vector<8x32xf32>
    %73 = vector.extract_strided_slice %69 {offsets = [0, 96], sizes = [8, 32], strides = [1, 1]} : vector<8x128xf32> to vector<8x32xf32>
    %74 = arith.mulf %71, %60 : vector<8x32xf32>
    %75 = arith.mulf %70, %72 : vector<8x32xf32>
    %76 = arith.addf %74, %75 : vector<8x32xf32>
    %77 = math.tanh %76 : vector<8x32xf32>
    %78 = arith.mulf %73, %77 : vector<8x32xf32>
    %79 = vector.extract_strided_slice %12 {offsets = [24, 0], sizes = [8, 128], strides = [1, 1]} : vector<64x128xf32> to vector<8x128xf32>
    %cst_21 = arith.constant dense<0.000000e+00> : vector<8x128xf32>
    %80 = tpu.matmul %78, %13, %cst_21 {dimension_numbers = #tpu.dot_dimension_numbers<[1], [0], [0], [1], [0, 0, 1, 1], [], []>} : vector<8x32xf32>, vector<32x128xf32>, vector<8x128xf32> -> vector<8x128xf32>
    %81 = arith.addf %79, %80 : vector<8x128xf32>
    %82 = arith.mulf %81, %22 : vector<8x128xf32>
    %83 = math.tanh %82 : vector<8x128xf32>
    %84 = arith.mulf %83, %25 : vector<8x128xf32>
    %85 = arith.addf %84, %28 : vector<8x128xf32>
    %86 = vector.extract_strided_slice %85 {offsets = [0, 0], sizes = [8, 32], strides = [1, 1]} : vector<8x128xf32> to vector<8x32xf32>
    %87 = vector.extract_strided_slice %85 {offsets = [0, 32], sizes = [8, 32], strides = [1, 1]} : vector<8x128xf32> to vector<8x32xf32>
    %88 = vector.extract_strided_slice %85 {offsets = [0, 64], sizes = [8, 32], strides = [1, 1]} : vector<8x128xf32> to vector<8x32xf32>
    %89 = vector.extract_strided_slice %85 {offsets = [0, 96], sizes = [8, 32], strides = [1, 1]} : vector<8x128xf32> to vector<8x32xf32>
    %90 = arith.mulf %87, %76 : vector<8x32xf32>
    %91 = arith.mulf %86, %88 : vector<8x32xf32>
    %92 = arith.addf %90, %91 : vector<8x32xf32>
    %93 = math.tanh %92 : vector<8x32xf32>
    %94 = arith.mulf %89, %93 : vector<8x32xf32>
    %95 = vector.extract_strided_slice %12 {offsets = [32, 0], sizes = [8, 128], strides = [1, 1]} : vector<64x128xf32> to vector<8x128xf32>
    %cst_22 = arith.constant dense<0.000000e+00> : vector<8x128xf32>
    %96 = tpu.matmul %94, %13, %cst_22 {dimension_numbers = #tpu.dot_dimension_numbers<[1], [0], [0], [1], [0, 0, 1, 1], [], []>} : vector<8x32xf32>, vector<32x128xf32>, vector<8x128xf32> -> vector<8x128xf32>
    %97 = arith.addf %95, %96 : vector<8x128xf32>
    %98 = arith.mulf %97, %22 : vector<8x128xf32>
    %99 = math.tanh %98 : vector<8x128xf32>
    %100 = arith.mulf %99, %25 : vector<8x128xf32>
    %101 = arith.addf %100, %28 : vector<8x128xf32>
    %102 = vector.extract_strided_slice %101 {offsets = [0, 0], sizes = [8, 32], strides = [1, 1]} : vector<8x128xf32> to vector<8x32xf32>
    %103 = vector.extract_strided_slice %101 {offsets = [0, 32], sizes = [8, 32], strides = [1, 1]} : vector<8x128xf32> to vector<8x32xf32>
    %104 = vector.extract_strided_slice %101 {offsets = [0, 64], sizes = [8, 32], strides = [1, 1]} : vector<8x128xf32> to vector<8x32xf32>
    %105 = vector.extract_strided_slice %101 {offsets = [0, 96], sizes = [8, 32], strides = [1, 1]} : vector<8x128xf32> to vector<8x32xf32>
    %106 = arith.mulf %103, %92 : vector<8x32xf32>
    %107 = arith.mulf %102, %104 : vector<8x32xf32>
    %108 = arith.addf %106, %107 : vector<8x32xf32>
    %109 = math.tanh %108 : vector<8x32xf32>
    %110 = arith.mulf %105, %109 : vector<8x32xf32>
    %111 = vector.extract_strided_slice %12 {offsets = [40, 0], sizes = [8, 128], strides = [1, 1]} : vector<64x128xf32> to vector<8x128xf32>
    %cst_23 = arith.constant dense<0.000000e+00> : vector<8x128xf32>
    %112 = tpu.matmul %110, %13, %cst_23 {dimension_numbers = #tpu.dot_dimension_numbers<[1], [0], [0], [1], [0, 0, 1, 1], [], []>} : vector<8x32xf32>, vector<32x128xf32>, vector<8x128xf32> -> vector<8x128xf32>
    %113 = arith.addf %111, %112 : vector<8x128xf32>
    %114 = arith.mulf %113, %22 : vector<8x128xf32>
    %115 = math.tanh %114 : vector<8x128xf32>
    %116 = arith.mulf %115, %25 : vector<8x128xf32>
    %117 = arith.addf %116, %28 : vector<8x128xf32>
    %118 = vector.extract_strided_slice %117 {offsets = [0, 0], sizes = [8, 32], strides = [1, 1]} : vector<8x128xf32> to vector<8x32xf32>
    %119 = vector.extract_strided_slice %117 {offsets = [0, 32], sizes = [8, 32], strides = [1, 1]} : vector<8x128xf32> to vector<8x32xf32>
    %120 = vector.extract_strided_slice %117 {offsets = [0, 64], sizes = [8, 32], strides = [1, 1]} : vector<8x128xf32> to vector<8x32xf32>
    %121 = vector.extract_strided_slice %117 {offsets = [0, 96], sizes = [8, 32], strides = [1, 1]} : vector<8x128xf32> to vector<8x32xf32>
    %122 = arith.mulf %119, %108 : vector<8x32xf32>
    %123 = arith.mulf %118, %120 : vector<8x32xf32>
    %124 = arith.addf %122, %123 : vector<8x32xf32>
    %125 = math.tanh %124 : vector<8x32xf32>
    %126 = arith.mulf %121, %125 : vector<8x32xf32>
    %127 = vector.extract_strided_slice %12 {offsets = [48, 0], sizes = [8, 128], strides = [1, 1]} : vector<64x128xf32> to vector<8x128xf32>
    %cst_24 = arith.constant dense<0.000000e+00> : vector<8x128xf32>
    %128 = tpu.matmul %126, %13, %cst_24 {dimension_numbers = #tpu.dot_dimension_numbers<[1], [0], [0], [1], [0, 0, 1, 1], [], []>} : vector<8x32xf32>, vector<32x128xf32>, vector<8x128xf32> -> vector<8x128xf32>
    %129 = arith.addf %127, %128 : vector<8x128xf32>
    %130 = arith.mulf %129, %22 : vector<8x128xf32>
    %131 = math.tanh %130 : vector<8x128xf32>
    %132 = arith.mulf %131, %25 : vector<8x128xf32>
    %133 = arith.addf %132, %28 : vector<8x128xf32>
    %134 = vector.extract_strided_slice %133 {offsets = [0, 0], sizes = [8, 32], strides = [1, 1]} : vector<8x128xf32> to vector<8x32xf32>
    %135 = vector.extract_strided_slice %133 {offsets = [0, 32], sizes = [8, 32], strides = [1, 1]} : vector<8x128xf32> to vector<8x32xf32>
    %136 = vector.extract_strided_slice %133 {offsets = [0, 64], sizes = [8, 32], strides = [1, 1]} : vector<8x128xf32> to vector<8x32xf32>
    %137 = vector.extract_strided_slice %133 {offsets = [0, 96], sizes = [8, 32], strides = [1, 1]} : vector<8x128xf32> to vector<8x32xf32>
    %138 = arith.mulf %135, %124 : vector<8x32xf32>
    %139 = arith.mulf %134, %136 : vector<8x32xf32>
    %140 = arith.addf %138, %139 : vector<8x32xf32>
    %141 = math.tanh %140 : vector<8x32xf32>
    %142 = arith.mulf %137, %141 : vector<8x32xf32>
    %143 = vector.extract_strided_slice %12 {offsets = [56, 0], sizes = [8, 128], strides = [1, 1]} : vector<64x128xf32> to vector<8x128xf32>
    %cst_25 = arith.constant dense<0.000000e+00> : vector<8x128xf32>
    %144 = tpu.matmul %142, %13, %cst_25 {dimension_numbers = #tpu.dot_dimension_numbers<[1], [0], [0], [1], [0, 0, 1, 1], [], []>} : vector<8x32xf32>, vector<32x128xf32>, vector<8x128xf32> -> vector<8x128xf32>
    %145 = arith.addf %143, %144 : vector<8x128xf32>
    %146 = arith.mulf %145, %22 : vector<8x128xf32>
    %147 = math.tanh %146 : vector<8x128xf32>
    %148 = arith.mulf %147, %25 : vector<8x128xf32>
    %149 = arith.addf %148, %28 : vector<8x128xf32>
    %150 = vector.extract_strided_slice %149 {offsets = [0, 0], sizes = [8, 32], strides = [1, 1]} : vector<8x128xf32> to vector<8x32xf32>
    %151 = vector.extract_strided_slice %149 {offsets = [0, 32], sizes = [8, 32], strides = [1, 1]} : vector<8x128xf32> to vector<8x32xf32>
    %152 = vector.extract_strided_slice %149 {offsets = [0, 64], sizes = [8, 32], strides = [1, 1]} : vector<8x128xf32> to vector<8x32xf32>
    %153 = vector.extract_strided_slice %149 {offsets = [0, 96], sizes = [8, 32], strides = [1, 1]} : vector<8x128xf32> to vector<8x32xf32>
    %154 = arith.mulf %151, %140 : vector<8x32xf32>
    %155 = arith.mulf %150, %152 : vector<8x32xf32>
    %156 = arith.addf %154, %155 : vector<8x32xf32>
    %157 = math.tanh %156 : vector<8x32xf32>
    %158 = arith.mulf %153, %157 : vector<8x32xf32>
    %c0_26 = arith.constant 0 : index
    %c0_27 = arith.constant 0 : index
    %159 = vector.load %arg5[%c0_26, %c0_27] : memref<32x128xf32, #tpu.memory_space<vmem>>, vector<32x128xf32>
    %cst_28 = arith.constant dense<0.000000e+00> : vector<8x128xf32>
    %160 = tpu.matmul %158, %159, %cst_28 {dimension_numbers = #tpu.dot_dimension_numbers<[1], [0], [0], [1], [0, 0, 1, 1], [], []>} : vector<8x32xf32>, vector<32x128xf32>, vector<8x128xf32> -> vector<8x128xf32>
    %c0_29 = arith.constant 0 : index
    %c0_30 = arith.constant 0 : index
    %161 = vector.load %arg6[%c0_29, %c0_30] : memref<1x128xf32, #tpu.memory_space<vmem>>, vector<1x128xf32>
    %162 = vector.broadcast %161 : vector<1x128xf32> to vector<8x128xf32>
    %163 = arith.addf %160, %162 : vector<8x128xf32>
    %c0_31 = arith.constant 0 : index
    %c0_32 = arith.constant 0 : index
    %164 = vector.load %arg7[%c0_31, %c0_32] : memref<8x128xf32, #tpu.memory_space<vmem>>, vector<8x128xf32>
    tpu.vector_store %arg7[%c0_31, %c0_32], %163 {strides = array<i32>} : memref<8x128xf32, #tpu.memory_space<vmem>>, vector<8x128xf32>,
    return
  }
}

</mosaic_0001>

<bundles_post_ra>
// kernel: model_forward.1
= control target key start
LH: loop header
LB: loop body
LE: loop exit
PB: predicated region body
PF: predicated region fallthrough
CT: control target
= control target key end

     0   :  { %12 = vsyncpa [#allocation3], 0  ;;  %s1122_s0 = inlined_call_operand.vmem [shape: s32[64,1], index: 0, kind: input, shape index: {}]   ;;  %s1123_s1 = inlined_call_operand.vmem [shape: f32[64,64], index: 1, kind: input, shape index: {}]   ;;  %s1124_s2 = inlined_call_operand.hbm [shape: f32[64,128], index: 2, kind: input, shape index: {}]   ;;  %s1125_s3 = inlined_call_operand.vmem [shape: f32[32,128], index: 3, kind: input, shape index: {}]   ;;  %s1126_s4 = inlined_call_operand.vmem [shape: f32[1,128], index: 4, kind: input, shape index: {}]   ;;  %s1127_s5 = inlined_call_operand.hbm [shape: f32[32,128], index: 5, kind: input, shape index: {}]   ;;  %s1128_s6 = inlined_call_operand.vmem [shape: f32[1,128], index: 6, kind: input, shape index: {}]   ;;  %s1129_s7 = inlined_call_operand.vmem [shape: f32[8,128], index: 7, kind: output, shape index: {}]  }
   0x1   :  { %s22_s26 = sshll.u32 %s1124_s2, 4  ;;  %s23_s26 = int_to_ptr.hbm [resolvable:$true] %s22_s26 }
   0x2   :  { %13 = vsyncpa [#allocation5], 0  ;;  %s837_s27 = smov [#allocation2]   ;;  %s39_s8 = sshll.u32 %s1127_s5, 4  ;;  %s40_s8 = int_to_ptr.hbm [resolvable:$true] %s39_s8 }
   0x3   :  { %s24_s28 = sshll.u32 %s837_s27, 4  ;;  %s838_s9 = smov 128   ;;  %s25_s28 = int_to_ptr.vmem [resolvable:$true] %s24_s28 }
   0x4   :  { %s839_s10 = smov 8   ;;  %s840_s11 = smov [#allocation4]  }
   0x5   :  { %30 = dma.hbm_to_vmem [thread:$0]  %s23_s26, 1024, %s25_s28, [#allocation3], %s838_s9, %s838_s9, %s839_s10  }
   0x6   :  { %s41_s12 = sshll.u32 %s840_s11, 4  ;;  %s42_s12 = int_to_ptr.vmem [resolvable:$true] %s41_s12 }
   0x7   :  { %47 = dma.hbm_to_vmem [thread:$0]  %s40_s8, 512, %s42_s12, [#allocation5], %s838_s9, %s838_s9, %s839_s10  }
   0x8   :  { %833 = dma.done.wait [#allocation3], 1024  }
   0x9   :  { %834 = vsyncadd [#allocation3], 4294966272 }
   0xa   :  { %835 = dma.done.wait [#allocation5], 512  }
   0xb   :  { %836 = vsyncadd [#allocation5], 4294966784  ;;  %v841_v0 = vmov 0   ;;  %v64_v1 = vld [vmem:[%s1122_s0 + $0x30] sm:$0xff]  ;;  %v58_v2 = vld [vmem:[%s1122_s0] sm:$0xff]  ;;  %v66_v15 = vlaneseq  ;;  %vm124_vm0 = vcmask 523264  }
   0xc   :  { %748 = vset.pattern.permute.xlu0 %v841_v0  ;;  %749 = vset.pattern.permute.xlu1 %v841_v0  ;;  %v123_v3 = vld [vmem:[%s1123_s1 + $0x38] sm:$0xff]  ;;  %v122_v4 = vld [vmem:[%s1123_s1 + $0x30] sm:$0xff]  ;;  %v121_v5 = vld [vmem:[%s1123_s1 + $0x28] sm:$0xff]  ;;  %v842_v19 = vmov 0.0   ;;  %v843_v41 = vmov 0.5   ;;  %s845_s18 = smov 32  }
   0xd   :  { %750 = vset.pattern.permute.xlu2 %v841_v0  ;;  %87 = vperm.xlu0 %748, %v64_v1   ;;  %v120_v6 = vld [vmem:[%s1123_s1 + $0x20] sm:$0xff]  ;;  %v65_v7 = vld [vmem:[%s1122_s0 + $0x38] sm:$0xff]  ;;  %v118_v9 = vld [vmem:[%s1123_s1 + $0x10] sm:$0xff]  ;;  %v925_v16 = vand.u32 127, %v66_v15  ;;  %vm276_vm9 = vcmask 261120  }
   0xe   :  { %69 = vperm.xlu1 %749, %v58_v2   ;;  %723 = vmatpush.msra.mxu3 %v123_v3  ;;  %v119_v8 = vld [vmem:[%s1123_s1 + $0x18] sm:$0xff]  ;;  %v117_v10 = vld [vmem:[%s1123_s1 + $0x8] sm:$0xff]  ;;  %v116_v11 = vld [vmem:[%s1123_s1] sm:$0xff] }
   0xf   :  { %157 = vmatpush.msra.mxu0 %v123_v3  ;;  %v197_v12 = vld [vmem:[#allocation2 + $0x38] sm:$0xff]  ;;  %v196_v13 = vld [vmem:[#allocation2 + $0x30] sm:$0xff]  ;;  %v195_v14 = vld [vmem:[#allocation2 + $0x28] sm:$0xff]  ;;  %vm271_vm4 = vcmp.ge.s32.totalorder %v925_v16, 64  ;;  %vm272_vm5 = vcmp.lt.s32.totalorder %v925_v16, 96 }
  0x10   :  { %724 = vmatpush.msra.mxu3 %v122_v4  ;;  %731 = vmatpush.msra.mxu2 %v197_v12  ;;  %v194_v24 = vld [vmem:[#allocation2 + $0x20] sm:$0xff]  ;;  %v193_v25 = vld [vmem:[#allocation2 + $0x18] sm:$0xff]  ;;  %v192_v26 = vld [vmem:[#allocation2 + $0x10] sm:$0xff] }
  0x11   :  { %158 = vmatpush.msra.mxu0 %v122_v4  ;;  %234 = vmatpush.msra.mxu1 %v197_v12  ;;  %v191_v27 = vld [vmem:[#allocation2 + $0x8] sm:$0xff]  ;;  %v190_v28 = vld [vmem:[#allocation2] sm:$0xff]  ;;  %v939_v29 = vld [vmem:[%s1125_s3 + $0x18] sm:$0xff] }
  0x12   :  { %725 = vmatpush.msra.mxu3 %v121_v5  ;;  %732 = vmatpush.msra.mxu2 %v196_v13  ;;  %v944_v30 = vld [vmem:[%s1125_s3 + $0x10] sm:$0xff]  ;;  %v951_v31 = vld [vmem:[%s1125_s3 + $0x8] sm:$0xff]  ;;  %v958_v32 = vld [vmem:[%s1125_s3] sm:$0xff] }
  0x13   :  { %159 = vmatpush.msra.mxu0 %v121_v5  ;;  %235 = vmatpush.msra.mxu1 %v196_v13  ;;  %v59_v36 = vld [vmem:[%s1122_s0 + $0x8] sm:$0xff]  ;;  %v991_v39 = vld [vmem:[%s1126_s4] ss:$0 sm:$0xff]  ;;  %vm273_vm6 = vmand %vm271_vm4, %vm272_vm5  ;;  %s844_s4 = smov 64  }
  0x14   :  { %726 = vmatpush.msra.mxu3 %v120_v6  ;;  %733 = vmatpush.msra.mxu2 %v195_v14  ;;  %v994_v42 = vsel %vm273_vm6, 1.0, %v843_v41  ;;  %v997_v47 = vsel %vm273_vm6, 0.0, %v843_v41  ;;  %v60_v59 = vld [vmem:[%s1122_s0 + $0x10] sm:$0xff] }
  0x15   :  { %160 = vmatpush.msra.mxu0 %v120_v6  ;;  %90 = vperm.xlu0 %748, %v65_v7  }
  0x16   :  { %727 = vmatpush.msra.mxu3 %v119_v8  ;;  %236 = vmatpush.msra.mxu1 %v195_v14 }
  0x17   :  { %161 = vmatpush.msra.mxu0 %v119_v8  ;;  %734 = vmatpush.msra.mxu2 %v194_v24 }
  0x18   :  { %728 = vmatpush.msra.mxu3 %v118_v9  ;;  %237 = vmatpush.msra.mxu1 %v194_v24 }
  0x19   :  { %162 = vmatpush.msra.mxu0 %v118_v9  ;;  %735 = vmatpush.msra.mxu2 %v193_v25 }
  0x1a   :  { %729 = vmatpush.msra.mxu3 %v117_v10  ;;  %238 = vmatpush.msra.mxu1 %v193_v25 }
  0x1b   :  { %163 = vmatpush.msra.mxu0 %v117_v10  ;;  %736 = vmatpush.msra.mxu2 %v192_v26 }
  0x1c   :  { %730 = vmatpush.msra.mxu3 %v116_v11  ;;  %239 = vmatpush.msra.mxu1 %v192_v26 }
  0x1d   :  { %164 = vmatpush.msra.mxu0 %v116_v11  ;;  %737 = vmatpush.msra.mxu2 %v191_v27 }
  0x1e   :  { %240 = vmatpush.msra.mxu1 %v191_v27  ;;  %339 = vmatpush.msrb.mxu3 %v939_v29 }
  0x1f   :  { %738 = vmatpush.msra.mxu2 %v190_v28  ;;  %72 = vperm.xlu2 %750, %v59_v36  }
  0x20   :  { %241 = vmatpush.msra.mxu1 %v190_v28  ;;  %340 = vmatpush.msrb.mxu3 %v944_v30 }
  0x21   :  { %292 = vmatpush.msrb.mxu2 %v939_v29 }
  0x22   :  { %341 = vmatpush.msrb.mxu3 %v951_v31 }
  0x23   :  { %293 = vmatpush.msrb.mxu2 %v944_v30 }
  0x24   :  { %342 = vmatpush.msrb.mxu3 %v958_v32 }
  0x25   :  { %294 = vmatpush.msrb.mxu2 %v951_v31 }
  0x27   :  { %295 = vmatpush.msrb.mxu2 %v958_v32 }
  0x79   :  { %v73_v50 = vpop.permute.xlu2 %72 }
  0x7a   :  { %vm93_vm7 = vcmp.eq.s32.totalorder %v73_v50, %v925_v16 }
  0x7b   :  { %v692_v51 = vsel %vm93_vm7, 1.0, %v842_v19 }
  0x7f   :  { %v88_v17 = vpop.permute.xlu0 %87 }
  0x80   :  { %v70_v18 = vpop.permute.xlu1 %69  ;;  %vm98_vm1 = vcmp.eq.s32.totalorder %v88_v17, %v925_v16  ;;  %v61_v17 = vld [vmem:[%s1122_s0 + $0x18] sm:$0xff] }
  0x81   :  { %vm92_vm2 = vcmp.eq.s32.totalorder %v70_v18, %v925_v16  ;;  %v697_v20 = vsel %vm98_vm1, 1.0, %v842_v19 }
  0x82   :  { %v691_v21 = vsel %vm92_vm2, 1.0, %v842_v19  ;;  %705 = vmatmul.msk.f32.vlgmr.msra.gmra.mxu3 %vm124_vm0, %v697_v20 }
  0x83   :  { %699 = vmatmul.msk.f32.vlgmr.msra.gmra.mxu0 %vm124_vm0, %v691_v21  ;;  %433 = vmatpush.msra.mxu3 %v939_v29 }
  0x85   :  { %434 = vmatpush.msra.mxu3 %v944_v30 }
  0x87   :  { %v91_v22 = vpop.permute.xlu0 %90  ;;  %435 = vmatpush.msra.mxu3 %v951_v31 }
  0x88   :  { %vm99_vm3 = vcmp.eq.s32.totalorder %v91_v22, %v925_v16 }
  0x89   :  { %v698_v23 = vsel %vm99_vm3, 1.0, %v842_v19  ;;  %436 = vmatpush.msra.mxu3 %v958_v32 }
  0x8a   :  { %706 = vmatmul.msk.f32.gmra.mxu3 %vm124_vm0, %v698_v23 }
  0x8b   :  { %700 = vmatmul.msk.f32.gmra.mxu0 %vm124_vm0, %v692_v51 }
 0x100   :  { %v166_v33 = vpop.f32.mrf.mxu0 }
 0x101   :  { %707 = vmatmul.msk.f32.vlgmr.msra.gmra.mxu1 %vm124_vm0, %v166_v33 }
 0x105   :  { %v969_v34 = vpop.f32.mrf.mxu3 }
 0x108   :  { %v169_v57 = vpop.f32.mrf.mxu0 }
 0x109   :  { %708 = vmatmul.msk.f32.gmra.mxu1 %vm124_vm0, %v169_v57 }
 0x10d   :  { %v187_v35 = vpop.f32.mrf.mxu3 }
 0x10e   :  { %714 = vmatmul.msk.f32.vlgmr.msra.gmra.mxu2 %vm124_vm0, %v187_v35 }
 0x10f   :  { %386 = vmatpush.msra.mxu2 %v939_v29 }
 0x111   :  { %387 = vmatpush.msra.mxu2 %v944_v30 }
 0x113   :  { %388 = vmatpush.msra.mxu2 %v951_v31 }
 0x115   :  { %389 = vmatpush.msra.mxu2 %v958_v32 }
 0x116   :  { %296 = vmatmul.f32.vlgmr.msrb.gmra.mxu2 %v842_v19 }
 0x117   :  { %480 = vmatpush.msrb.mxu2 %v939_v29 }
 0x119   :  { %481 = vmatpush.msrb.mxu2 %v944_v30 }
 0x11b   :  { %482 = vmatpush.msrb.mxu2 %v951_v31 }
 0x11d   :  { %483 = vmatpush.msrb.mxu2 %v958_v32 }
 0x17e   :  { %v243_v38 = vpop.f32.mrf.mxu1 }
 0x17f   :  { %v244_v40 = vadd.f32 %v991_v39, %v243_v38 }
 0x186   :  { %v246_v2 = vpop.f32.mrf.mxu1 }
 0x187   :  { %v247_v3 = vadd.f32 %v991_v39, %v246_v2 }
 0x191   :  { %v984_v37 = vpop.f32.mrf.mxu2 }
 0x199   :  { %v297_v43 = vpop.f32.mrf.mxu2 }
 0x19a   :  { %v300_v44 = vadd.f32 %v297_v43, %v244_v40 }
 0x19c   :  { %v301_v45 = vmul.f32 %v300_v44, %v994_v42 }
 0x19e   :  { %753 = vtanh.f32 %v301_v45 }
 0x1a4   :  { %v754_v46 = vpop.eup %753 }
 0x1a5   :  { %v303_v48 = vmul.f32 %v754_v46, %v994_v42 }
 0x1a7   :  { %v304_v49 = vadd.f32 %v303_v48, %v997_v47  ;;  %v62_v48 = vld [vmem:[%s1122_s0 + $0x20] sm:$0xff] }
 0x1a9   :  { %307 = vrot.lane.b32.xlu1 %v304_v49, %s844_s4  ;;  %v305_v54 = vmul.f32 0.0, %v304_v49 }
 0x21b   :  { %v308_v52 = vpop.permute.xlu1 %307 }
 0x21c   :  { %v310_v53 = vmul.f32 %v308_v52, %v304_v49 }
 0x21e   :  { %312 = vrot.lane.b32.xlu2 %v310_v53, %s845_s18 }
 0x278   :  { %v313_v55 = vpop.permute.xlu2 %312 }
 0x279   :  { %v315_v56 = vadd.f32 %v313_v55, %v305_v54 }
 0x27b   :  { %755 = vtanh.f32 %v315_v56 }
 0x281   :  { %v756_v58 = vpop.eup %755 }
 0x282   :  { %318 = vrot.lane.b32.xlu0 %v756_v58, %s844_s4 }
 0x28a   :  { %75 = vperm.xlu0 %748, %v60_v59  }
 0x2f4   :  { %v319_v60 = vpop.permute.xlu0 %318 }
 0x2f5   :  { %v321_v61 = vmul.f32 %v319_v60, %v304_v49 }
 0x2f7   :  { %323 = vrot.lane.b32.xlu1 %v321_v61, %s845_s18 }
 0x2fc   :  { %v76_v62 = vpop.permute.xlu0 %75 }
 0x2fd   :  { %vm94_vm8 = vcmp.eq.s32.totalorder %v76_v62, %v925_v16 }
 0x2fe   :  { %v693_v63 = vsel %vm94_vm8, 1.0, %v842_v19 }
 0x2ff   :  { %701 = vmatmul.msk.f32.gmra.mxu0 %vm124_vm0, %v693_v63 }
 0x369   :  { %v324_v0 = vpop.permute.xlu1 %323 }
 0x36a   :  { %715 = vmatmul.msk.f32.vlgmr.msrb.gmra.mxu3 %vm276_vm9, %v324_v0 }
 0x36b   :  { %527 = vmatpush.msrb.mxu3 %v939_v29 }
 0x36d   :  { %528 = vmatpush.msrb.mxu3 %v944_v30 }
 0x36f   :  { %529 = vmatpush.msrb.mxu3 %v951_v31 }
 0x371   :  { %530 = vmatpush.msrb.mxu3 %v958_v32 }
 0x37c   :  { %v172_v1 = vpop.f32.mrf.mxu0 }
 0x37d   :  { %709 = vmatmul.msk.f32.gmra.mxu1 %vm124_vm0, %v172_v1  ;;  %v63_v1 = vld [vmem:[%s1122_s0 + $0x28] sm:$0xff] }
 0x3ed   :  { %v344_v4 = vpop.f32.mrf.mxu3 }
 0x3ee   :  { %v347_v5 = vadd.f32 %v344_v4, %v247_v3 }
 0x3f0   :  { %v348_v6 = vmul.f32 %v347_v5, %v994_v42 }
 0x3f2   :  { %757 = vtanh.f32 %v348_v6 }
 0x3f8   :  { %v758_v7 = vpop.eup %757 }
 0x3f9   :  { %v350_v8 = vmul.f32 %v758_v7, %v994_v42 }
 0x3fa   :  { %v249_v25 = vpop.f32.mrf.mxu1 }
 0x3fb   :  { %v351_v9 = vadd.f32 %v350_v8, %v997_v47  ;;  %v250_v26 = vadd.f32 %v991_v39, %v249_v25 }
 0x3fd   :  { %354 = vrot.lane.b32.xlu2 %v351_v9, %s844_s4  ;;  %v352_v12 = vmul.f32 %v351_v9, %v315_v56 }
 0x457   :  { %v355_v10 = vpop.permute.xlu2 %354 }
 0x458   :  { %v357_v11 = vmul.f32 %v355_v10, %v351_v9 }
 0x45a   :  { %359 = vrot.lane.b32.xlu1 %v357_v11, %s845_s18 }
 0x4cc   :  { %v360_v13 = vpop.permute.xlu1 %359 }
 0x4cd   :  { %v362_v14 = vadd.f32 %v360_v13, %v352_v12 }
 0x4cf   :  { %759 = vtanh.f32 %v362_v14 }
 0x4d5   :  { %v760_v15 = vpop.eup %759 }
 0x4d6   :  { %365 = vrot.lane.b32.xlu2 %v760_v15, %s844_s4 }
 0x4de   :  { %78 = vperm.xlu2 %750, %v61_v17  }
 0x530   :  { %v366_v18 = vpop.permute.xlu2 %365 }
 0x531   :  { %v368_v20 = vmul.f32 %v366_v18, %v351_v9 }
 0x533   :  { %370 = vrot.lane.b32.xlu0 %v368_v20, %s845_s18 }
 0x538   :  { %v79_v21 = vpop.permute.xlu2 %78 }
 0x539   :  { %vm95_vm10 = vcmp.eq.s32.totalorder %v79_v21, %v925_v16 }
 0x53a   :  { %v694_v22 = vsel %vm95_vm10, 1.0, %v842_v19 }
 0x53b   :  { %702 = vmatmul.msk.f32.gmra.mxu0 %vm124_vm0, %v694_v22 }
 0x5a5   :  { %v371_v23 = vpop.permute.xlu0 %370 }
 0x5a6   :  { %716 = vmatmul.msk.f32.vlgmr.msra.gmra.mxu2 %vm276_vm9, %v371_v23 }
 0x5a7   :  { %574 = vmatpush.msra.mxu2 %v939_v29 }
 0x5a9   :  { %575 = vmatpush.msra.mxu2 %v944_v30 }
 0x5ab   :  { %576 = vmatpush.msra.mxu2 %v951_v31 }
 0x5ad   :  { %577 = vmatpush.msra.mxu2 %v958_v32 }
 0x5b8   :  { %v175_v24 = vpop.f32.mrf.mxu0 }
 0x5b9   :  { %710 = vmatmul.msk.f32.gmra.mxu1 %vm124_vm0, %v175_v24 }
 0x629   :  { %v391_v27 = vpop.f32.mrf.mxu2 }
 0x62a   :  { %v394_v28 = vadd.f32 %v391_v27, %v250_v26 }
 0x62c   :  { %v395_v33 = vmul.f32 %v394_v28, %v994_v42 }
 0x62e   :  { %761 = vtanh.f32 %v395_v33 }
 0x634   :  { %v762_v35 = vpop.eup %761 }
 0x635   :  { %v397_v36 = vmul.f32 %v762_v35, %v994_v42 }
 0x636   :  { %v252_v55 = vpop.f32.mrf.mxu1 }
 0x637   :  { %v398_v38 = vadd.f32 %v397_v36, %v997_v47  ;;  %v253_v56 = vadd.f32 %v991_v39, %v252_v55 }
 0x639   :  { %401 = vrot.lane.b32.xlu1 %v398_v38, %s844_s4  ;;  %v399_v43 = vmul.f32 %v398_v38, %v362_v14 }
 0x6ab   :  { %v402_v40 = vpop.permute.xlu1 %401 }
 0x6ac   :  { %v404_v41 = vmul.f32 %v402_v40, %v398_v38 }
 0x6ae   :  { %406 = vrot.lane.b32.xlu0 %v404_v41, %s845_s18 }
 0x720   :  { %v407_v44 = vpop.permute.xlu0 %406 }
 0x721   :  { %v409_v45 = vadd.f32 %v407_v44, %v399_v43 }
 0x723   :  { %763 = vtanh.f32 %v409_v45 }
 0x729   :  { %v764_v46 = vpop.eup %763 }
 0x72a   :  { %412 = vrot.lane.b32.xlu1 %v764_v46, %s844_s4 }
 0x732   :  { %81 = vperm.xlu1 %749, %v62_v48  }
 0x79c   :  { %v413_v49 = vpop.permute.xlu1 %412 }
 0x79d   :  { %v415_v50 = vmul.f32 %v413_v49, %v398_v38 }
 0x79f   :  { %417 = vrot.lane.b32.xlu2 %v415_v50, %s845_s18 }
 0x7a4   :  { %v82_v51 = vpop.permute.xlu1 %81 }
 0x7a5   :  { %vm96_vm11 = vcmp.eq.s32.totalorder %v82_v51, %v925_v16 }
 0x7a6   :  { %v695_v52 = vsel %vm96_vm11, 1.0, %v842_v19 }
 0x7a7   :  { %703 = vmatmul.msk.f32.gmra.mxu0 %vm124_vm0, %v695_v52 }
 0x7f9   :  { %v418_v53 = vpop.permute.xlu2 %417 }
 0x7fa   :  { %717 = vmatmul.msk.f32.vlgmr.msra.gmra.mxu3 %vm276_vm9, %v418_v53 }
 0x7fb   :  { %621 = vmatpush.msra.mxu3 %v939_v29 }
 0x7fd   :  { %622 = vmatpush.msra.mxu3 %v944_v30 }
 0x7ff   :  { %623 = vmatpush.msra.mxu3 %v951_v31 }
 0x801   :  { %624 = vmatpush.msra.mxu3 %v958_v32 }
 0x824   :  { %v178_v54 = vpop.f32.mrf.mxu0 }
 0x825   :  { %711 = vmatmul.msk.f32.gmra.mxu1 %vm124_vm0, %v178_v54 }
 0x87d   :  { %v438_v57 = vpop.f32.mrf.mxu3 }
 0x87e   :  { %v441_v58 = vadd.f32 %v438_v57, %v253_v56 }
 0x880   :  { %v442_v59 = vmul.f32 %v441_v58, %v994_v42 }
 0x882   :  { %765 = vtanh.f32 %v442_v59 }
 0x888   :  { %v766_v60 = vpop.eup %765 }
 0x889   :  { %v444_v29 = vmul.f32 %v766_v60, %v994_v42 }
 0x88b   :  { %v445_v30 = vadd.f32 %v444_v29, %v997_v47 }
 0x88d   :  { %448 = vrot.lane.b32.xlu0 %v445_v30, %s844_s4  ;;  %v446_v61 = vmul.f32 %v445_v30, %v409_v45 }
 0x8a2   :  { %v255_v8 = vpop.f32.mrf.mxu1 }
 0x8a3   :  { %v256_v9 = vadd.f32 %v991_v39, %v255_v8 }
 0x8ff   :  { %v449_v31 = vpop.permute.xlu0 %448 }
 0x900   :  { %v451_v32 = vmul.f32 %v449_v31, %v445_v30 }
 0x902   :  { %453 = vrot.lane.b32.xlu2 %v451_v32, %s845_s18 }
 0x95c   :  { %v454_v62 = vpop.permute.xlu2 %453 }
 0x95d   :  { %v456_v63 = vadd.f32 %v454_v62, %v446_v61 }
 0x95f   :  { %767 = vtanh.f32 %v456_v63 }
 0x965   :  { %v768_v0 = vpop.eup %767 }
 0x966   :  { %459 = vrot.lane.b32.xlu0 %v768_v0, %s844_s4 }
 0x96e   :  { %84 = vperm.xlu0 %748, %v63_v1  }
 0x9d8   :  { %v460_v2 = vpop.permute.xlu0 %459 }
 0x9d9   :  { %v462_v3 = vmul.f32 %v460_v2, %v445_v30 }
 0x9db   :  { %464 = vrot.lane.b32.xlu1 %v462_v3, %s845_s18 }
 0x9e0   :  { %v85_v4 = vpop.permute.xlu0 %84 }
 0x9e1   :  { %vm97_vm12 = vcmp.eq.s32.totalorder %v85_v4, %v925_v16 }
 0x9e2   :  { %v696_v5 = vsel %vm97_vm12, 1.0, %v842_v19 }
 0x9e3   :  { %704 = vmatmul.msk.f32.gmra.mxu0 %vm124_vm0, %v696_v5 }
 0xa4d   :  { %v465_v6 = vpop.permute.xlu1 %464 }
 0xa4e   :  { %718 = vmatmul.msk.f32.vlgmr.msrb.gmra.mxu2 %vm276_vm9, %v465_v6 }
 0xa60   :  { %v181_v7 = vpop.f32.mrf.mxu0 }
 0xa61   :  { %712 = vmatmul.msk.f32.gmra.mxu1 %vm124_vm0, %v181_v7 }
 0xa69   :  { %713 = vmatmul.msk.f32.gmra.mxu1 %vm124_vm0, %v969_v34 }
 0xad1   :  { %v485_v10 = vpop.f32.mrf.mxu2 }
 0xad2   :  { %v488_v11 = vadd.f32 %v485_v10, %v256_v9 }
 0xad4   :  { %v489_v16 = vmul.f32 %v488_v11, %v994_v42  ;;  %v653_v11 = vld [vmem:[#allocation4 + $0x10] sm:$0xff] }
 0xad6   :  { %769 = vtanh.f32 %v489_v16  ;;  %v652_v16 = vld [vmem:[#allocation4 + $0x8] sm:$0xff] }
 0xadc   :  { %v770_v19 = vpop.eup %769 }
 0xadd   :  { %v491_v12 = vmul.f32 %v770_v19, %v994_v42 }
 0xade   :  { %v258_v24 = vpop.f32.mrf.mxu1 }
 0xadf   :  { %v492_v13 = vadd.f32 %v491_v12, %v997_v47  ;;  %v259_v25 = vadd.f32 %v991_v39, %v258_v24 }
 0xae1   :  { %495 = vrot.lane.b32.xlu2 %v492_v13, %s844_s4  ;;  %v493_v34 = vmul.f32 %v492_v13, %v456_v63  ;;  %v265_v63 = vadd.f32 %v991_v39, %v984_v37 }
 0xae6   :  { %v261_v50 = vpop.f32.mrf.mxu1 }
 0xae7   :  { %v262_v51 = vadd.f32 %v991_v39, %v261_v50  ;;  %v654_v39 = vld [vmem:[#allocation4 + $0x18] sm:$0xff] }
 0xae8   :  { %676 = vmatpush.msrb.mxu2 %v654_v39 }
 0xaea   :  { %677 = vmatpush.msrb.mxu2 %v653_v11 }
 0xaec   :  { %678 = vmatpush.msrb.mxu2 %v652_v16 }
 0xb3b   :  { %v496_v14 = vpop.permute.xlu2 %495 }
 0xb3c   :  { %v498_v15 = vmul.f32 %v496_v14, %v492_v13 }
 0xb3e   :  { %500 = vrot.lane.b32.xlu1 %v498_v15, %s845_s18 }
 0xbb0   :  { %v501_v17 = vpop.permute.xlu1 %500 }
 0xbb1   :  { %v503_v18 = vadd.f32 %v501_v17, %v493_v34 }
 0xbb3   :  { %771 = vtanh.f32 %v503_v18 }
 0xbb9   :  { %v772_v20 = vpop.eup %771 }
 0xbba   :  { %506 = vrot.lane.b32.xlu2 %v772_v20, %s844_s4 }
 0xc14   :  { %v507_v21 = vpop.permute.xlu2 %506 }
 0xc15   :  { %v509_v22 = vmul.f32 %v507_v21, %v492_v13  ;;  %v752_v13 = vld [vmem:[%s1128_s6] ss:$0 sm:$0xff] }
 0xc17   :  { %511 = vrot.lane.b32.xlu0 %v509_v22, %s845_s18 }
 0xc89   :  { %v512_v23 = vpop.permute.xlu0 %511 }
 0xc8a   :  { %719 = vmatmul.msk.f32.vlgmr.msrb.gmra.mxu3 %vm276_vm9, %v512_v23 }
 0xd0d   :  { %v532_v26 = vpop.f32.mrf.mxu3 }
 0xd0e   :  { %v535_v27 = vadd.f32 %v532_v26, %v259_v25 }
 0xd10   :  { %v536_v28 = vmul.f32 %v535_v27, %v994_v42 }
 0xd12   :  { %773 = vtanh.f32 %v536_v28 }
 0xd18   :  { %v774_v33 = vpop.eup %773 }
 0xd19   :  { %v538_v35 = vmul.f32 %v774_v33, %v994_v42 }
 0xd1b   :  { %v539_v36 = vadd.f32 %v538_v35, %v997_v47 }
 0xd1d   :  { %542 = vrot.lane.b32.xlu1 %v539_v36, %s844_s4  ;;  %v540_v41 = vmul.f32 %v539_v36, %v503_v18 }
 0xd8f   :  { %v543_v38 = vpop.permute.xlu1 %542 }
 0xd90   :  { %v545_v40 = vmul.f32 %v543_v38, %v539_v36 }
 0xd92   :  { %547 = vrot.lane.b32.xlu2 %v545_v40, %s845_s18 }
 0xdec   :  { %v548_v43 = vpop.permute.xlu2 %547 }
 0xded   :  { %v550_v44 = vadd.f32 %v548_v43, %v540_v41 }
 0xdef   :  { %775 = vtanh.f32 %v550_v44 }
 0xdf5   :  { %v776_v45 = vpop.eup %775 }
 0xdf6   :  { %553 = vrot.lane.b32.xlu0 %v776_v45, %s844_s4 }
 0xe68   :  { %v554_v46 = vpop.permute.xlu0 %553 }
 0xe69   :  { %v556_v48 = vmul.f32 %v554_v46, %v539_v36 }
 0xe6b   :  { %558 = vrot.lane.b32.xlu1 %v556_v48, %s845_s18 }
 0xedd   :  { %v559_v49 = vpop.permute.xlu1 %558 }
 0xede   :  { %720 = vmatmul.msk.f32.vlgmr.msra.gmra.mxu2 %vm276_vm9, %v559_v49 }
 0xf61   :  { %v579_v52 = vpop.f32.mrf.mxu2 }
 0xf62   :  { %v582_v53 = vadd.f32 %v579_v52, %v262_v51 }
 0xf64   :  { %v583_v54 = vmul.f32 %v582_v53, %v994_v42 }
 0xf66   :  { %777 = vtanh.f32 %v583_v54 }
 0xf6c   :  { %v778_v55 = vpop.eup %777 }
 0xf6d   :  { %v585_v56 = vmul.f32 %v778_v55, %v994_v42 }
 0xf6f   :  { %v586_v57 = vadd.f32 %v585_v56, %v997_v47 }
 0xf71   :  { %589 = vrot.lane.b32.xlu2 %v586_v57, %s844_s4  ;;  %v587_v60 = vmul.f32 %v586_v57, %v550_v44 }
 0xfcb   :  { %v590_v58 = vpop.permute.xlu2 %589 }
 0xfcc   :  { %v592_v59 = vmul.f32 %v590_v58, %v586_v57 }
 0xfce   :  { %594 = vrot.lane.b32.xlu0 %v592_v59, %s845_s18 }
0x1040   :  { %v595_v29 = vpop.permute.xlu0 %594 }
0x1041   :  { %v597_v30 = vadd.f32 %v595_v29, %v587_v60 }
0x1043   :  { %779 = vtanh.f32 %v597_v30 }
0x1049   :  { %v780_v31 = vpop.eup %779 }
0x104a   :  { %600 = vrot.lane.b32.xlu1 %v780_v31, %s844_s4 }
0x10bc   :  { %v601_v32 = vpop.permute.xlu1 %600 }
0x10bd   :  { %v603_v61 = vmul.f32 %v601_v32, %v586_v57 }
0x10bf   :  { %605 = vrot.lane.b32.xlu2 %v603_v61, %s845_s18 }
0x1119   :  { %v606_v62 = vpop.permute.xlu2 %605 }
0x111a   :  { %721 = vmatmul.msk.f32.vlgmr.msra.gmra.mxu3 %vm276_vm9, %v606_v62 }
0x119d   :  { %v626_v0 = vpop.f32.mrf.mxu3 }
0x119e   :  { %v629_v1 = vadd.f32 %v626_v0, %v265_v63 }
0x11a0   :  { %v630_v2 = vmul.f32 %v629_v1, %v994_v42 }
0x11a2   :  { %781 = vtanh.f32 %v630_v2 }
0x11a8   :  { %v782_v3 = vpop.eup %781 }
0x11a9   :  { %v632_v4 = vmul.f32 %v782_v3, %v994_v42  ;;  %v651_v42 = vld [vmem:[#allocation4] sm:$0xff] }
0x11aa   :  { %679 = vmatpush.msrb.mxu2 %v651_v42 }
0x11ab   :  { %v633_v5 = vadd.f32 %v632_v4, %v997_v47 }
0x11ad   :  { %636 = vrot.lane.b32.xlu0 %v633_v5, %s844_s4  ;;  %v634_v8 = vmul.f32 %v633_v5, %v597_v30 }
0x121f   :  { %v637_v6 = vpop.permute.xlu0 %636 }
0x1220   :  { %v639_v7 = vmul.f32 %v637_v6, %v633_v5 }
0x1222   :  { %641 = vrot.lane.b32.xlu1 %v639_v7, %s845_s18 }
0x1294   :  { %v642_v9 = vpop.permute.xlu1 %641 }
0x1295   :  { %v644_v10 = vadd.f32 %v642_v9, %v634_v8 }
0x1297   :  { %783 = vtanh.f32 %v644_v10 }
0x129d   :  { %v784_v37 = vpop.eup %783 }
0x129e   :  { %647 = vrot.lane.b32.xlu2 %v784_v37, %s844_s4 }
0x12f8   :  { %v648_v47 = vpop.permute.xlu2 %647 }
0x12f9   :  { %v650_v19 = vmul.f32 %v648_v47, %v633_v5 }
0x12fb   :  { %660 = vrot.lane.b32.xlu0 %v650_v19, %s845_s18 }
0x136d   :  { %v661_v12 = vpop.permute.xlu0 %660 }
0x136e   :  { %722 = vmatmul.msk.f32.vlgmr.msrb.gmra.mxu2 %vm276_vm9, %v661_v12 }
0x13f1   :  { %v681_v14 = vpop.f32.mrf.mxu2 }
0x13f2   :  { %v682_v15 = vadd.f32 %v752_v13, %v681_v14 }
0x13f4   :  { %684 = vst [vmem:[%s1129_s7] sm:$0xff] %v682_v15 }
0x13f5   :  { %689 = vsyncpa [#allocation3], 1 }
0x13f6   :  { %690 = vsyncpa [#allocation5], 1 }

</bundles_post_ra>
